<compile_context>
chip_gen: v6e
topology: v6e:2x2x1
jax: 0.10.0
libtpu: 0.0.40
codegen_flags: <defaults>
</compile_context>

<pallas_src>
import functools
import math

import jax
import jax.numpy as jnp
from jax import lax
from jax.experimental import pallas as pl
from jax.experimental.pallas import tpu as pltpu


_NEG_INF = -1e9  # matches torch masked_fill(mask == 0, -1e9)


@functools.lru_cache(maxsize=None)
def _vmem_limit():
    """Scoped-VMEM budget from the actual chip (3/4 of physical, capped at 96 MiB)."""
    try:
        cap = int(pltpu.get_tpu_info().vmem_capacity_bytes)
    except Exception:
        cap = 64 * 1024 * 1024          # conservative fallback (safe on v5e/v6e/v7x)
    return int(min(cap * 3 // 4, 96 * 1024 * 1024))


def _pick_tile(dim, cap, align):
    """Largest tile <= cap that is a multiple of `align` and divides `dim`; small dims use the
    full dim (block == full array dim is always legal)."""
    if dim <= cap:
        return dim
    t = (cap // align) * align
    while t >= align:
        if dim % t == 0:
            return t
        t -= align
    # TODO(synk): no aligned divisor -> full-dim block; tail-masked seq tiles would bound VMEM here.
    return dim


def _tile_pad(dim, cap, align):
    """(tile, padded_dim): honors the cap even when no aligned divisor exists by padding the
    array to a tile multiple instead of falling back to a full-dim block."""
    if dim <= cap:
        return dim, dim
    t = (cap // align) * align
    d = t
    while d >= align:
        if dim % d == 0:
            return d, dim
        d -= align
    return t, ((dim + t - 1) // t) * t


# ---------------------------------------------------------------------------
# Tiled linear projection: y = x @ W + b,  W stored (d_in, d_out) (no per-call transpose)
# ---------------------------------------------------------------------------
def _make_linear_kernel(mma_dtype):
    mma = jnp.dtype(mma_dtype) if mma_dtype is not None else None

    def kernel(x_ref, w_ref, b_ref, o_ref, acc_ref):
        @pl.when(pl.program_id(2) == 0)
        def _():
            acc_ref[...] = jnp.zeros_like(acc_ref)

        xt, wt = x_ref[...], w_ref[...]
        if mma is not None and xt.dtype != mma:     # bf16 MXU operands, f32 accumulation
            xt = xt.astype(mma)
            wt = wt.astype(mma)
        acc_ref[...] += jnp.dot(xt, wt, preferred_element_type=jnp.float32)

        @pl.when(pl.program_id(2) == pl.num_programs(2) - 1)
        def _():
            o_ref[...] = (acc_ref[...] + b_ref[...].astype(jnp.float32)).astype(o_ref.dtype)

    return kernel


def pallas_linear(x, w, b, *, mma_dtype=None, tm_cap=None, tn_cap=None, tk_cap=None,
                  vmem_limit=None):
    """x: (M, d_in); w: (d_in, d_out); b: (1, d_out)."""
    limit = vmem_limit or _vmem_limit()
    big = limit >= 80 * (1 << 20)                   # 128-MiB-VMEM parts (v5e / v6e)
    tm_cap = tm_cap or (512 if big else 256)
    tn_cap = tn_cap or (512 if big else 256)
    tk_cap = tk_cap or 512

    M, K = x.shape
    N = w.shape[1]
    tm, Mp = _tile_pad(M, tm_cap, 8)
    tn, Np = _tile_pad(N, tn_cap, 128)
    tk, Kp = _tile_pad(K, tk_cap, 128)
    if (Mp, Kp) != (M, K):
        x = jnp.pad(x, ((0, Mp - M), (0, Kp - K)))
    if (Kp, Np) != (K, N):
        w = jnp.pad(w, ((0, Kp - K), (0, Np - N)))
    if Np != N:
        b = jnp.pad(b, ((0, 0), (0, Np - N)))

    grid = (Mp // tm, Np // tn, Kp // tk)
    bytes_acc = int((x.size + w.size + b.size + Mp * Np) * x.dtype.itemsize)
    out = pl.pallas_call(
        _make_linear_kernel(mma_dtype),
        grid=grid,
        in_specs=[
            pl.BlockSpec((tm, tk), lambda i, j, k: (i, k)),
            pl.BlockSpec((tk, tn), lambda i, j, k: (k, j)),
            pl.BlockSpec((1, tn), lambda i, j, k: (0, j)),
        ],
        out_specs=pl.BlockSpec((tm, tn), lambda i, j, k: (i, j)),
        out_shape=jax.ShapeDtypeStruct((Mp, Np), x.dtype),
        scratch_shapes=[pltpu.VMEM((tm, tn), jnp.float32)],
        compiler_params=pltpu.CompilerParams(
            dimension_semantics=("parallel", "parallel", "arbitrary"),
            vmem_limit_bytes=limit),
        cost_estimate=pl.CostEstimate(
            flops=2 * Mp * Np * Kp, transcendentals=0, bytes_accessed=bytes_acc),
    )(x, w, b)
    if (Mp, Np) != (M, N):
        out = out[:M, :N]
    return out


# ---------------------------------------------------------------------------
# Flash-style attention (no attention-prob writeback): grid (B, q_tiles, k_tiles)
# ---------------------------------------------------------------------------
def _make_flash_kernel(H, Dh, masked, mma_dtype):
    mma = jnp.dtype(mma_dtype) if mma_dtype is not None else None

    def kernel(*refs):
        if masked:
            q_ref, k_ref, v_ref, mask_ref, o_ref, m_sc, l_sc, acc_sc = refs
        else:
            q_ref, k_ref, v_ref, o_ref, m_sc, l_sc, acc_sc = refs
        ki = pl.program_id(2)

        @pl.when(ki == 0)
        def _():
            m_sc[...] = jnp.full_like(m_sc, -jnp.inf)
            l_sc[...] = jnp.zeros_like(l_sc)
            acc_sc[...] = jnp.zeros_like(acc_sc)

        q = q_ref[...]                                    # (tq, H*Dh) lane-dense slab
        k = k_ref[...]                                    # (tk, H*Dh)
        v = v_ref[...]                                    # (tk, H*Dh)
        if mma is not None and q.dtype != mma:            # bf16 MXU operands, f32 accumulate
            q, k, v = q.astype(mma), k.astype(mma), v.astype(mma)
        mask0 = (mask_ref[...] == 0) if masked else None  # int8 tile, shared by all heads

        # Heads share the K/V tile; the softmax scale is folded into w_qs (no VPU scaling).
        # TODO(synk): for H >= ~16 switch this static unroll to lax.fori_loop (vreg pressure).
        for h in range(H):
            sl = slice(h * Dh, (h + 1) * Dh)
            # Contract last dims directly (no k.T / XLU transpose before the MXU).
            s = lax.dot_general(q[:, sl], k[:, sl], (((1,), (1,)), ((), ())),
                                preferred_element_type=jnp.float32)
            if masked:
                s = jnp.where(mask0, _NEG_INF, s)
            m_prev = m_sc[:, h:h + 1]                     # (tq, 1)
            m_new = jnp.maximum(m_prev, jnp.max(s, axis=-1, keepdims=True))
            alpha = jnp.exp(m_prev - m_new)
            p = jnp.exp(s - m_new)                        # (tq, tk) f32
            l_sc[:, h:h + 1] = alpha * l_sc[:, h:h + 1] + jnp.sum(p, axis=-1, keepdims=True)
            acc_sc[:, sl] = alpha * acc_sc[:, sl] + jnp.dot(
                p.astype(v.dtype), v[:, sl], preferred_element_type=jnp.float32)
            m_sc[:, h:h + 1] = m_new

        @pl.when(ki == pl.num_programs(2) - 1)
        def _():
            for h in range(H):
                sl = slice(h * Dh, (h + 1) * Dh)
                inv_l = pl.reciprocal(l_sc[:, h:h + 1], approx=True)   # EUP slot, ~free
                acc_sc[:, sl] = acc_sc[:, sl] * inv_l
            o_ref[...] = acc_sc[...].astype(o_ref.dtype)  # single lane-dense (unmasked) store

    return kernel


def flash_attention(q2, k2, v2, mask, *, batch, n_head, d_head,
                    q_col=0, k_col=0, v_col=0, mma_dtype=None,
                    tq_cap=None, tk_cap=None, vmem_limit=None):
    """q2/k2/v2: (B*L, >=H*Dh) projected slabs (may all be the same fused QKV slab; *_col
    selects the H*Dh-wide column block). Returns (B*Lq, H*Dh)."""
    H, Dh = n_head, d_head
    d_inner = H * Dh
    Lq = q2.shape[0] // batch
    Lk = k2.shape[0] // batch
    assert Lq % 8 == 0 and Lk % 8 == 0, "sequence lengths must be multiples of 8"
    if q_col or k_col or v_col:
        assert d_inner % 128 == 0, "fused QKV column blocks need H*Dh % 128 == 0"

    limit = vmem_limit or _vmem_limit()
    itemsize = q2.dtype.itemsize
    # ~10 live (rows x H*Dh) buffers (q/k/v/out double-buffered + f32 acc) within ~60% of VMEM.
    cap_default = 512 if limit >= 80 * (1 << 20) else 256
    budget_rows = int(limit * 0.6) // max(10 * d_inner * itemsize, 1)
    cap = max(128, min(cap_default, (budget_rows // 128) * 128))
    tq = _pick_tile(Lq, tq_cap or cap, 8)
    tk = _pick_tile(Lk, tk_cap or cap, 128)
    nq, nk = Lq // tq, Lk // tk

    in_specs = [
        pl.BlockSpec((tq, d_inner), lambda b, qi, ki, c=q_col: (b * nq + qi, c)),
        pl.BlockSpec((tk, d_inner), lambda b, qi, ki, c=k_col: (b * nk + ki, c)),
        pl.BlockSpec((tk, d_inner), lambda b, qi, ki, c=v_col: (b * nk + ki, c)),
    ]
    args = [q2, k2, v2]
    if mask is not None:
        # one (tq, tk) int8 mask tile per grid step, shared by all heads (== mask.unsqueeze(1))
        in_specs.append(pl.BlockSpec((None, tq, tk), lambda b, qi, ki: (b, qi, ki)))
        args.append(mask)

    bytes_acc = int((2 * batch * Lq + 2 * batch * Lk * nq) * d_inner * itemsize)
    if mask is not None:
        bytes_acc += int(mask.size * mask.dtype.itemsize)

    return pl.pallas_call(
        _make_flash_kernel(H, Dh, mask is not None, mma_dtype),
        grid=(batch, nq, nk),
        in_specs=in_specs,
        out_specs=pl.BlockSpec((tq, d_inner), lambda b, qi, ki: (b * nq + qi, 0)),
        out_shape=jax.ShapeDtypeStruct((batch * Lq, d_inner), q2.dtype),
        scratch_shapes=[pltpu.VMEM((tq, H), jnp.float32),        # m (lane-packed running max)
                        pltpu.VMEM((tq, H), jnp.float32),        # l (lane-packed running sum)
                        pltpu.VMEM((tq, d_inner), jnp.float32)],  # lane-dense accumulator
        compiler_params=pltpu.CompilerParams(
            dimension_semantics=("parallel", "parallel", "arbitrary"),
            vmem_limit_bytes=limit),
        cost_estimate=pl.CostEstimate(
            flops=4 * batch * H * Lq * Lk * Dh,
            transcendentals=batch * H * Lq * Lk,
            bytes_accessed=bytes_acc),
    )(*args)


# ---------------------------------------------------------------------------
# Attention that also returns the probabilities (torch-equivalent return signature)
# ---------------------------------------------------------------------------
def _make_probs_kernel(H, Dh, masked, mma_dtype):
    mma = jnp.dtype(mma_dtype) if mma_dtype is not None else None

    def kernel(*refs):
        if masked:
            q_ref, k_ref, v_ref, mask_ref, o_ref, attn_ref = refs
        else:
            q_ref, k_ref, v_ref, o_ref, attn_ref = refs
        q, k, v = q_ref[...], k_ref[...], v_ref[...]
        if mma is not None and q.dtype != mma:
            q, k, v = q.astype(mma), k.astype(mma), v.astype(mma)
        mask0 = (mask_ref[...] == 0) if masked else None

        for h in range(H):
            sl = slice(h * Dh, (h + 1) * Dh)
            s = lax.dot_general(q[:, sl], k[:, sl], (((1,), (1,)), ((), ())),
                                preferred_element_type=jnp.float32)  # scale folded into w_qs
            if masked:
                s = jnp.where(mask0, _NEG_INF, s)
            e = jnp.exp(s - jnp.max(s, axis=-1, keepdims=True))
            p = e * (1.0 / jnp.sum(e, axis=-1, keepdims=True))       # exact divide (torch parity)
            # TODO(synk): attention dropout (F.dropout, p=0.1) omitted — non-deterministic RNG.
            attn_ref[h] = p.astype(attn_ref.dtype)
            o_ref[:, sl] = jnp.dot(p.astype(v.dtype), v[:, sl],
                                   preferred_element_type=jnp.float32).astype(o_ref.dtype)

    return kernel


def attention_with_probs(q2, k2, v2, mask, *, batch, n_head, d_head,
                         q_col=0, k_col=0, v_col=0, mma_dtype=None,
                         tq_cap=256, vmem_limit=None):
    """Returns (out (B*Lq, H*Dh), attn (B, H, Lq, Lk) in the input dtype)."""
    H, Dh = n_head, d_head
    d_inner = H * Dh
    Lq = q2.shape[0] // batch
    Lk = k2.shape[0] // batch
    assert Lq % 8 == 0 and Lk % 8 == 0, "sequence lengths must be multiples of 8"
    if q_col or k_col or v_col:
        assert d_inner % 128 == 0, "fused QKV column blocks need H*Dh % 128 == 0"

    limit = vmem_limit or _vmem_limit()
    itemsize = q2.dtype.itemsize
    # VMEM budget: resident K/V (double-buffered) + per-q-row probs/q/out/mask tiles + f32 temps.
    fixed = 4 * Lk * d_inner * itemsize
    per_row = (2 * H * Lk * itemsize + 4 * d_inner * itemsize
               + (2 * Lk if mask is not None else 0) + 4 * Lk * 4)
    avail = (limit * 4) // 5 - fixed
    tq_budget = max(8, (avail // max(per_row, 1)) // 8 * 8)
    # TODO(synk): very long Lk (tiny tq budget) would want a two-pass flash-stats + streaming
    # normalize scheme to stay pipelined; not needed at these shapes.
    tq = _pick_tile(Lq, min(tq_cap, tq_budget), 8)
    nq = Lq // tq

    in_specs = [
        pl.BlockSpec((tq, d_inner), lambda b, qi, c=q_col: (b * nq + qi, c)),
        pl.BlockSpec((Lk, d_inner), lambda b, qi, c=k_col: (b, c)),   # resident across q tiles
        pl.BlockSpec((Lk, d_inner), lambda b, qi, c=v_col: (b, c)),
    ]
    args = [q2, k2, v2]
    if mask is not None:
        in_specs.append(pl.BlockSpec((None, tq, Lk), lambda b, qi: (b, qi, 0)))
        args.append(mask)

    out_specs = (
        pl.BlockSpec((tq, d_inner), lambda b, qi: (b * nq + qi, 0)),
        pl.BlockSpec((None, H, tq, Lk), lambda b, qi: (b, 0, qi, 0)),
    )
    out_shape = (
        jax.ShapeDtypeStruct((batch * Lq, d_inner), q2.dtype),
        jax.ShapeDtypeStruct((batch, H, Lq, Lk), q2.dtype),   # probs in input dtype
    )

    bytes_acc = int((2 * batch * Lq * d_inner + 2 * batch * Lk * d_inner
                     + batch * H * Lq * Lk) * itemsize)
    if mask is not None:
        bytes_acc += int(mask.size * mask.dtype.itemsize)

    return pl.pallas_call(
        _make_probs_kernel(H, Dh, mask is not None, mma_dtype),
        grid=(batch, nq),
        in_specs=in_specs,
        out_specs=out_specs,
        out_shape=out_shape,
        compiler_params=pltpu.CompilerParams(
            dimension_semantics=("parallel", "parallel"),
            vmem_limit_bytes=limit),
        cost_estimate=pl.CostEstimate(
            flops=4 * batch * H * Lq * Lk * Dh,
            transcendentals=batch * H * Lq * Lk,
            bytes_accessed=bytes_acc),
    )(*args)


# ---------------------------------------------------------------------------
# MultiheadAttention module (deterministic synthetic parameters)
# ---------------------------------------------------------------------------
class MultiheadAttentionPallas:
    """Forward-pass equivalent of the PyTorch MultiheadAttention module (dropout omitted)."""

    def __init__(self, d_model, n_head, dropout=0.1, key=None, dtype=jnp.float32,
                 mma_dtype=jnp.bfloat16):
        self.d_model = d_model
        self.n_head = n_head
        self.d_head = math.ceil(d_model / n_head)
        self.dropout = dropout           # TODO(synk): dropout not applied (see probs kernel)
        self.mma_dtype = mma_dtype       # MXU operand dtype (f32 accumulation everywhere)
        d_inner = n_head * self.d_head
        self._d_inner = d_inner

        if key is None:
            key = jax.random.PRNGKey(0)
        k_qs, k_ks, k_vs, k_out = jax.random.split(key, 4)

        def xavier(k_, fan_in, fan_out):
            limit = math.sqrt(6.0 / (fan_in + fan_out))
            # stored (d_in, d_out): MXU-native layout, no per-call transpose needed
            return jax.random.uniform(k_, (fan_in, fan_out), dtype, -limit, limit)

        scale = 1.0 / math.sqrt(self.d_head)    # softmax scale folded into the q projection
        self.w_qs = xavier(k_qs, d_model, d_inner) * jnp.asarray(scale, dtype)
        self.b_qs = jnp.zeros((1, d_inner), dtype)   # zero bias; a nonzero bias would be scaled too
        self.w_ks, self.b_ks = xavier(k_ks, d_model, d_inner), jnp.zeros((1, d_inner), dtype)
        self.w_vs, self.b_vs = xavier(k_vs, d_model, d_inner), jnp.zeros((1, d_inner), dtype)
        self.w_out, self.b_out = xavier(k_out, d_inner, d_model), jnp.zeros((1, d_model), dtype)

        # Fused QKV weights: one projection for self-attention (q is k is v); the attention
        # kernels read the q/k/v column blocks of the fused slab directly (no HBM slices).
        self.w_qkv = jnp.concatenate([self.w_qs, self.w_ks, self.w_vs], axis=1)
        self.b_qkv = jnp.concatenate([self.b_qs, self.b_ks, self.b_vs], axis=1)

    def __call__(self, q, k, v, attn_mask=None, return_attn=True):
        B, Lq, _ = q.shape
        Lk = k.shape[1]
        H, Dh = self.n_head, self.d_head
        d_inner = self._d_inner
        mmad = self.mma_dtype

        mask = None
        if attn_mask is not None:
            mask = (attn_mask != 0).astype(jnp.int8)   # int8: 4x less mask HBM traffic

        # Projections stay as lane-dense (B*L, H*Dh) slabs; heads are lane slices, so no
        # HBM-side head transpose is ever materialized.
        fused = (q is k) and (k is v) and (d_inner % 128 == 0)
        if fused:
            qkv = pallas_linear(q.reshape(B * Lq, -1), self.w_qkv, self.b_qkv, mma_dtype=mmad)
            qp = kp = vp = qkv
            q_col, k_col, v_col = 0, 1, 2
        else:
            qp = pallas_linear(q.reshape(B * Lq, -1), self.w_qs, self.b_qs, mma_dtype=mmad)
            kp = pallas_linear(k.reshape(B * Lk, -1), self.w_ks, self.b_ks, mma_dtype=mmad)
            vp = pallas_linear(v.reshape(B * Lk, -1), self.w_vs, self.b_vs, mma_dtype=mmad)
            q_col = k_col = v_col = 0

        if return_attn:
            out2, attn = attention_with_probs(
                qp, kp, vp, mask, batch=B, n_head=H, d_head=Dh,
                q_col=q_col, k_col=k_col, v_col=v_col, mma_dtype=mmad)
        else:
            out2 = flash_attention(
                qp, kp, vp, mask, batch=B, n_head=H, d_head=Dh,
                q_col=q_col, k_col=k_col, v_col=v_col, mma_dtype=mmad)
            attn = None

        out = pallas_linear(out2, self.w_out, self.b_out,
                            mma_dtype=mmad).reshape(B, Lq, self.d_model)
        return out, attn


def _reference_mha(mha, q, k, v, attn_mask=None):
    """Pure-JAX f32 reference (uses the stored, already scale-folded weights)."""
    B, Lq, _ = q.shape
    Lk = k.shape[1]
    H, Dh = mha.n_head, mha.d_head

    def proj(x, w, b, L):
        return (x.reshape(B * L, -1) @ w + b).reshape(B, L, H, Dh).transpose(0, 2, 1, 3)

    qp = proj(q, mha.w_qs, mha.b_qs, Lq)
    kp = proj(k, mha.w_ks, mha.b_ks, Lk)
    vp = proj(v, mha.w_vs, mha.b_vs, Lk)
    s = jnp.einsum("bhqd,bhkd->bhqk", qp, kp)
    if attn_mask is not None:
        s = jnp.where(attn_mask[:, None, :, :] == 0, _NEG_INF, s)
    attn = jax.nn.softmax(s, axis=-1)
    o = jnp.einsum("bhqk,bhkd->bhqd", attn, vp).transpose(0, 2, 1, 3).reshape(B * Lq, H * Dh)
    out = (o @ mha.w_out + mha.b_out).reshape(B, Lq, mha.d_model)
    return out, attn


if __name__ == "__main__":
    key = jax.random.PRNGKey(0)
    k_q, k_k, k_v, k_param, k_x, k_param2 = jax.random.split(key, 6)
    tol = dict(atol=5e-2, rtol=5e-2)    # bf16 MXU operands with f32 accumulation

    # --- config 1: small d_model (non-fused projections), separate q/k/v -----------------
    B, L, d_model, n_head = 2, 8, 32, 4
    q = jax.random.normal(k_q, (B, L, d_model), jnp.float32)
    k = jax.random.normal(k_k, (B, L, d_model), jnp.float32)
    v = jax.random.normal(k_v, (B, L, d_model), jnp.float32)
    mask = jnp.broadcast_to(jnp.tril(jnp.ones((L, L), jnp.int32)), (B, L, L))

    mha = MultiheadAttentionPallas(d_model, n_head, dropout=0.1, key=k_param)

    out, attn = mha(q, k, v, attn_mask=None)                         # probs path
    out_f, _ = mha(q, k, v, attn_mask=None, return_attn=False)       # flash path
    out_m, attn_m = mha(q, k, v, attn_mask=mask)
    out_mf, _ = mha(q, k, v, attn_mask=mask, return_attn=False)
    ref_out, ref_attn = _reference_mha(mha, q, k, v)
    ref_out_m, ref_attn_m = _reference_mha(mha, q, k, v, attn_mask=mask)
    jax.block_until_ready((out, attn, out_f, out_m, attn_m, out_mf))

    assert out.shape == (B, L, d_model) and attn.shape == (B, n_head, L, L)
    assert jnp.allclose(out, out_f, **tol)
    assert jnp.allclose(out_m, out_mf, **tol)
    assert jnp.allclose(out, ref_out, **tol)
    assert jnp.allclose(out_m, ref_out_m, **tol)
    assert jnp.allclose(attn, ref_attn, atol=5e-2)
    assert jnp.allclose(attn_m, ref_attn_m, atol=5e-2)
    assert jnp.allclose(jnp.sum(attn, axis=-1), 1.0, atol=1e-3)
    assert jnp.allclose(jnp.sum(attn_m, axis=-1), 1.0, atol=1e-3)

    # --- config 2: H*Dh % 128 == 0 -> fused-QKV self-attention path -----------------------
    d_model2, n_head2 = 256, 2
    x = jax.random.normal(k_x, (B, L, d_model2), jnp.float32)
    mask2 = jnp.broadcast_to(jnp.tril(jnp.ones((L, L), jnp.int32)), (B, L, L))
    mha2 = MultiheadAttentionPallas(d_model2, n_head2, dropout=0.1, key=k_param2)

    out_s, attn_s = mha2(x, x, x, attn_mask=mask2)                        # fused + probs
    out_sf, _ = mha2(x, x, x, attn_mask=mask2, return_attn=False)         # fused + flash
    xc = x + 0.0                                                          # breaks `is` -> non-fused
    out_nf, _ = mha2(x, xc, xc, attn_mask=mask2)
    ref_out_s, ref_attn_s = _reference_mha(mha2, x, x, x, attn_mask=mask2)
    jax.block_until_ready((out_s, attn_s, out_sf, out_nf))

    assert out_s.shape == (B, L, d_model2) and attn_s.shape == (B, n_head2, L, L)
    assert jnp.allclose(out_s, out_sf, **tol)
    assert jnp.allclose(out_s, out_nf, **tol)
    assert jnp.allclose(out_s, ref_out_s, **tol)
    assert jnp.allclose(attn_s, ref_attn_s, atol=5e-2)
    assert jnp.allclose(jnp.sum(attn_s, axis=-1), 1.0, atol=1e-3)

    print("KERNEL_OK")
</pallas_src>

<mosaic_0001>
module attributes {stable_mosaic.version = 11 : i64} {
  func.func @kernel(%arg0: i32, %arg1: i32, %arg2: i32, %arg3: memref<16x32xf32, #tpu.memory_space<vmem>>, %arg4: memref<32x32xf32, #tpu.memory_space<vmem>>, %arg5: memref<1x32xf32, #tpu.memory_space<vmem>>, %arg6: memref<16x32xf32, #tpu.memory_space<vmem>>, %arg7: memref<16x32xf32, #tpu.memory_space<vmem>>) attributes {dimension_semantics = [#tpu.dimension_semantics<parallel>, #tpu.dimension_semantics<parallel>, #tpu.dimension_semantics<arbitrary>], iteration_bounds = array<i64: 1, 1, 1>, scalar_prefetch = 0 : i64, scratch_operands = 1 : i64, tpu.core_type = #tpu.core_type<tc>, window_params = [{transform_indices = @transform_0, window_bounds = array<i64: 16, 32>}, {transform_indices = @transform_1, window_bounds = array<i64: 32, 32>}, {transform_indices = @transform_2, window_bounds = array<i64: 1, 32>}, {transform_indices = @transform_3, window_bounds = array<i64: 16, 32>}]} {
    %c0_i32 = arith.constant 0 : i32
    %0 = arith.cmpi eq, %arg2, %c0_i32 : i32
    %1 = arith.extui %0 : i1 to i32
    %c0_i32_0 = arith.constant 0 : i32
    %2 = arith.cmpi ne, %1, %c0_i32_0 : i32
    scf.if %2 {
      %cst_10 = arith.constant 0.000000e+00 : f32
      %14 = vector.broadcast %cst_10 : f32 to vector<16x32xf32>
      %c0_11 = arith.constant 0 : index
      %c0_12 = arith.constant 0 : index
      %15 = vector.load %arg7[%c0_11, %c0_12] : memref<16x32xf32, #tpu.memory_space<vmem>>, vector<16x32xf32>
      tpu.vector_store %arg7[%c0_11, %c0_12], %14 {strides = array<i32>} : memref<16x32xf32, #tpu.memory_space<vmem>>, vector<16x32xf32>,
    } else {
    }
    %c0 = arith.constant 0 : index
    %c0_1 = arith.constant 0 : index
    %3 = vector.load %arg3[%c0, %c0_1] : memref<16x32xf32, #tpu.memory_space<vmem>>, vector<16x32xf32>
    %c0_2 = arith.constant 0 : index
    %c0_3 = arith.constant 0 : index
    %4 = vector.load %arg4[%c0_2, %c0_3] : memref<32x32xf32, #tpu.memory_space<vmem>>, vector<32x32xf32>
    %5 = arith.truncf %3 : vector<16x32xf32> to vector<16x32xbf16>
    %6 = arith.truncf %4 : vector<32x32xf32> to vector<32x32xbf16>
    %c0_4 = arith.constant 0 : index
    %c0_5 = arith.constant 0 : index
    %7 = vector.load %arg7[%c0_4, %c0_5] : memref<16x32xf32, #tpu.memory_space<vmem>>, vector<16x32xf32>
    %cst = arith.constant dense<0.000000e+00> : vector<16x32xf32>
    %8 = tpu.matmul %5, %6, %cst {dimension_numbers = #tpu.dot_dimension_numbers<[1], [0], [0], [1], [0, 0, 1, 1], [], []>} : vector<16x32xbf16>, vector<32x32xbf16>, vector<16x32xf32> -> vector<16x32xf32>
    %9 = arith.addf %7, %8 : vector<16x32xf32>
    %c0_6 = arith.constant 0 : index
    %c0_7 = arith.constant 0 : index
    %10 = vector.load %arg7[%c0_6, %c0_7] : memref<16x32xf32, #tpu.memory_space<vmem>>, vector<16x32xf32>
    tpu.vector_store %arg7[%c0_6, %c0_7], %9 {strides = array<i32>} : memref<16x32xf32, #tpu.memory_space<vmem>>, vector<16x32xf32>,
    %c0_i32_8 = arith.constant 0 : i32
    %11 = arith.cmpi eq, %arg2, %c0_i32_8 : i32
    %12 = arith.extui %11 : i1 to i32
    %c0_i32_9 = arith.constant 0 : i32
    %13 = arith.cmpi ne, %12, %c0_i32_9 : i32
    scf.if %13 {
      %c0_10 = arith.constant 0 : index
      %c0_11 = arith.constant 0 : index
      %14 = vector.load %arg7[%c0_10, %c0_11] : memref<16x32xf32, #tpu.memory_space<vmem>>, vector<16x32xf32>
      %c0_12 = arith.constant 0 : index
      %c0_13 = arith.constant 0 : index
      %15 = vector.load %arg5[%c0_12, %c0_13] : memref<1x32xf32, #tpu.memory_space<vmem>>, vector<1x32xf32>
      %16 = vector.broadcast %15 : vector<1x32xf32> to vector<16x32xf32>
      %17 = arith.addf %14, %16 : vector<16x32xf32>
      %c0_14 = arith.constant 0 : index
      %c0_15 = arith.constant 0 : index
      %18 = vector.load %arg6[%c0_14, %c0_15] : memref<16x32xf32, #tpu.memory_space<vmem>>, vector<16x32xf32>
      tpu.vector_store %arg6[%c0_14, %c0_15], %17 {strides = array<i32>} : memref<16x32xf32, #tpu.memory_space<vmem>>, vector<16x32xf32>,
    } else {
    }
    return
  }
  func.func @transform_0(%arg0: i32, %arg1: i32, %arg2: i32) -> (i32, i32) {
    %c0_i32 = arith.constant 0 : i32
    return %arg0, %arg2 : i32, i32
  }
  func.func @transform_1(%arg0: i32, %arg1: i32, %arg2: i32) -> (i32, i32) {
    %c0_i32 = arith.constant 0 : i32
    return %arg2, %arg1 : i32, i32
  }
  func.func @transform_2(%arg0: i32, %arg1: i32, %arg2: i32) -> (i32, i32) {
    %c0_i32 = arith.constant 0 : i32
    %c0_i32_0 = arith.constant 0 : i32
    return %c0_i32, %arg1 : i32, i32
  }
  func.func @transform_3(%arg0: i32, %arg1: i32, %arg2: i32) -> (i32, i32) {
    %c0_i32 = arith.constant 0 : i32
    return %arg0, %arg1 : i32, i32
  }
}

</mosaic_0001>

<bundles_post_ra>
// kernel: tpu_custom_call.1
= control target key start
LH: loop header
LB: loop body
LE: loop exit
PB: predicated region body
PF: predicated region fallthrough
CT: control target
= control target key end

     0   :  { %8 = vsyncpa [#allocation4], 0  ;;  %s286_s0 = inlined_call_operand.hbm [shape: f32[16,32], index: 0, kind: input, shape index: {}]   ;;  %s287_s1 = inlined_call_operand.hbm [shape: f32[32,32], index: 1, kind: input, shape index: {}]   ;;  %s288_s2 = inlined_call_operand.vmem [shape: f32[1,32], index: 2, kind: input, shape index: {}]   ;;  %s289_s3 = inlined_call_operand.hbm [shape: f32[16,32], index: 3, kind: output, shape index: {}]  }
   0x1   :  { %9 = vsyncpa [#allocation7], 0 }
   0x2   :  { %10 = vsyncpa [#allocation5], 0  ;;  %s231_s12 = smov [#allocation3]  }
   0x3   :  { %s16_s13 = sshll.u32 %s231_s12, 4  ;;  %s17_s13 = int_to_ptr.vmem [resolvable:$true] %s16_s13 }
   0x4   :  { %s173_s14 = scalar_lea.vmem %s17_s13, 256  ;;  %p178_p1 = scmp.lt.s32.totalorder %s17_s13, %s17_s13 }
   0x5   :  { %p174_p0 = scmp.ne.s32.totalorder %s17_s13, %s173_s14  ;;  %p179_p2 = scmp.lt.s32.totalorder %s173_s14, %s173_s14 }
   0x7   :  { %p180_p3 = por %p179_p2, %p178_p1 }
   0x9   :  { %p181_p4 = pnand %p180_p3, %p174_p0 }
   0xb   :  { %184 = shalt.err (!%p181_p4)
}
   0xc   :  { %s232_s15 = smov 128   ;;  %s233_s16 = smov 8  }
   0xd   :  { %22 = dma.hbm_to_vmem [thread:$0]  %s286_s0, 256, %s17_s13, [#allocation4], %s232_s15, %s232_s15, %s233_s16  }
   0xe   :  { %s234_s19 = smov [#allocation6]  }
   0xf   :  { %s28_s20 = sshll.u32 %s234_s19, 4  ;;  %s29_s20 = int_to_ptr.vmem [resolvable:$true] %s28_s20 }
  0x10   :  { %s193_s21 = scalar_lea.vmem %s29_s20, 512  ;;  %p198_p6 = scmp.lt.s32.totalorder %s29_s20, %s29_s20 }
  0x11   :  { %p194_p5 = scmp.ne.s32.totalorder %s29_s20, %s193_s21  ;;  %p199_p7 = scmp.lt.s32.totalorder %s193_s21, %s193_s21 }
  0x13   :  { %p200_p8 = por %p199_p7, %p198_p6 }
  0x15   :  { %p201_p9 = pnand %p200_p8, %p194_p5 }
  0x17   :  { %204 = shalt.err (!%p201_p9)
}
  0x18   :  { %34 = dma.hbm_to_vmem [thread:$0]  %s287_s1, 512, %s29_s20, [#allocation7], %s232_s15, %s232_s15, %s233_s16  }
  0x19   :  { %225 = dma.done.wait [#allocation4], 256  }
  0x1a   :  { %226 = vsyncadd [#allocation4], 4294967040 }
  0x1b   :  { %227 = dma.done.wait [#allocation7], 512  }
  0x1c   :  { %228 = vsyncadd [#allocation7], 4294966784  ;;  %vm48_vm0 = vcmask 261120   ;;  %v235_v0 = vmov 0.0   ;;  %vm236_vm1 = vmmov 0   ;;  %v55_v1 = vld [vmem:[#allocation6 + $0x10] sm:$0xff] }
  0x1d   :  { %150 = vmatprep.subr.bf16.mxu0 %v235_v0  ;;  %154 = vmatprep.mubr.msk.bf16.mxu0 %vm236_vm1, %v235_v0  ;;  %49 = vst.msk [vmem:[#allocation2] sm:$0xff] %vm48_vm0, %v235_v0  ;;  %50 = vst.msk [vmem:[#allocation2 + $0x8] sm:$0xff] %vm48_vm0, %v235_v0  ;;  %v56_v2 = vld [vmem:[#allocation6 + $0x18] sm:$0xff]  ;;  %v53_v3 = vld [vmem:[#allocation6] sm:$0xff]  ;;  %s237_s24 = smov [#allocation8]  }
  0x1e   :  { %v59_v4 = vpack.c.bf16 %v56_v2, %v55_v1  ;;  %v54_v5 = vld [vmem:[#allocation6 + $0x8] sm:$0xff]  ;;  %v51_v7 = vld [vmem:[#allocation3] sm:$0xff]  ;;  %v52_v8 = vld [vmem:[#allocation3 + $0x8] sm:$0xff]  ;;  %s132_s25 = sshll.u32 %s237_s24, 4  ;;  %s133_s25 = int_to_ptr.vmem [resolvable:$true] %s132_s25 }
  0x1f   :  { %v58_v6 = vpack.c.bf16 %v54_v5, %v53_v3  ;;  %v57_v9 = vpack.c.bf16 %v52_v8, %v51_v7  ;;  %v146_v18 = vld [vmem:[%s288_s2] ss:$0 sm:$0xff]  ;;  %s205_s26 = scalar_lea.vmem %s133_s25, 256  ;;  %p210_p11 = scmp.lt.s32.totalorder %s133_s25, %s133_s25 }
  0x20   :  { %151 = vmatpush3.bf16.msra.mxu0 %v59_v4  ;;  %p206_p10 = scmp.ne.s32.totalorder %s133_s25, %s205_s26  ;;  %p211_p12 = scmp.lt.s32.totalorder %s205_s26, %s205_s26 }
  0x21   :  { %152 = vmatprep.subr.bf16.mxu0 %v235_v0 }
  0x22   :  { %p212_p13 = por %p211_p12, %p210_p11 }
  0x24   :  { %153 = vmatpush3.bf16.msra.mxu0 %v58_v6  ;;  %v60_v10 = vld [vmem:[#allocation2] sm:$0xff]  ;;  %v61_v14 = vld [vmem:[#allocation2 + $0x8] sm:$0xff]  ;;  %p213_p0 = pnand %p212_p13, %p206_p10 }
  0x27   :  { %155 = vmatmul.mubr.msk.bf16.vlgmr.msra.gmra.mxu0 %vm48_vm0, %v57_v9 }
  0xe7   :  { %v100_v11 = vpop.f32.mrf.mxu0 }
  0xe8   :  { %v107_v12 = vadd.f32 %v100_v11, %v60_v10 }
  0xe9   :  { %v156_v13 = vpop.f32.mrf.mxu0 }
  0xea   :  { %109 = vst.msk [vmem:[#allocation2] sm:$0xff] %vm48_vm0, %v107_v12 }
  0xeb   :  { %v103_v15 = vpop.f32.mrf.mxu0 }
  0xec   :  { %v108_v16 = vadd.f32 %v103_v15, %v61_v14 }
  0xed   :  { %v157_v17 = vpop.f32.mrf.mxu0 }
  0xee   :  { %110 = vst.msk [vmem:[#allocation2 + $0x8] sm:$0xff] %vm48_vm0, %v108_v16 }
  0xf1   :  { %v114_v19 = vld [vmem:[#allocation2] sm:$0xff] }
  0xf2   :  { %v123_v20 = vadd.f32 %v146_v18, %v114_v19 }
  0xf4   :  { %125 = vst.msk [vmem:[#allocation8] sm:$0xff] %vm48_vm0, %v123_v20 }
  0xf5   :  { %v115_v21 = vld [vmem:[#allocation2 + $0x8] sm:$0xff] }
  0xf6   :  { %v124_v22 = vadd.f32 %v146_v18, %v115_v21 }
  0xf8   :  { %126 = vst.msk [vmem:[#allocation8 + $0x8] sm:$0xff] %vm48_vm0, %v124_v22 }
  0xf9   :  { %216 = shalt.err (!%p213_p0)
}
  0xfa   :  { %138 = dma.vmem_to_hbm [thread:$0]  %s133_s25, 256, %s289_s3, [#allocation5], %s232_s15, %s232_s15, %s233_s16  }
  0xfb   :  { %229 = dma.done.wait [#allocation5], 256  }
  0xfc   :  { %230 = vsyncadd [#allocation5], 4294967040 }
  0xfd   :  { %142 = vsyncpa [#allocation4], 1 }
  0xfe   :  { %143 = vsyncpa [#allocation7], 1 }
  0xff   :  { %144 = vsyncpa [#allocation5], 1 }

</bundles_post_ra>
